<compile_context>
chip_gen: v5e
topology: v5e:2x2
jax: 0.10.0
libtpu: 0.0.40
codegen_flags: <defaults>
</compile_context>

<pallas_src>
import functools

import jax
import jax.numpy as jnp
from jax.experimental import pallas as pl
from jax.experimental.pallas import tpu as pltpu


def _silu_and_mul_kernel(gate_ref, up_ref, o_ref, *, approx_sigmoid: bool):
    gate = gate_ref[...].astype(jnp.float32)
    up = up_ref[...].astype(jnp.float32)
    if approx_sigmoid:
        # One true transcendental (exp on the EUP) + near-free approx
        # reciprocal; keeps the EUP off the critical path for bf16 streams.
        sig = pl.reciprocal(1.0 + jnp.exp(-gate), approx=True)
    else:
        sig = jax.nn.sigmoid(gate)
    # f32 multiplies, single downcast at the store.
    o_ref[...] = (gate * sig * up).astype(o_ref.dtype)


def _round_up(n: int, m: int) -> int:
    return ((n + m - 1) // m) * m


def _block_budget(itemsize: int):
    """Return (block_byte_target, vmem_limit_bytes), per chip generation."""
    phys_vmem = 128 << 20
    try:
        phys_vmem = int(getattr(pltpu.get_tpu_info(), "vmem_capacity_bytes", phys_vmem))
    except Exception:
        pass
    if phys_vmem <= (80 << 20):
        # v7x-class: 64 MiB VMEM per TC but ~3.2 TB/s HBM -> bigger blocks,
        # tighter total-VMEM cap to leave double-buffer headroom.
        return (3 << 20), (44 << 20)
    # v5e / v6e: 128 MiB physical VMEM; raise past v5e's 16 MiB scoped default.
    return (2 << 20), (64 << 20)


def silu_and_mul(x: jax.Array) -> jax.Array:
    """Computes silu(x[..., :d]) * x[..., d:] where d = x.shape[-1] // 2."""
    assert x.shape[-1] % 2 == 0 and x.shape[-1] > 0, "last dim must be even and > 0"
    two_d = x.shape[-1]
    d = two_d // 2

    lead_shape = x.shape[:-1]
    n_rows = 1
    for s in lead_shape:
        n_rows *= s
    x2 = x.reshape(n_rows, two_d)

    itemsize = jnp.dtype(x.dtype).itemsize
    # Sublane packing: 8 for 4-byte, 16 for 2-byte, 32 for 1-byte dtypes.
    sublane = max(8, 32 // max(itemsize, 1))

    # Pad lane-unaligned hidden dims up to a multiple of 128 so the kernel
    # always sees lane-dense, tile-aligned gate/up/out slabs.
    d_pad = max(128, _round_up(d, 128))
    if d_pad != d:
        pad = jnp.zeros((n_rows, d_pad - d), dtype=x.dtype)
        x2 = jnp.concatenate([x2[:, :d], pad, x2[:, d:], pad], axis=-1)

    block_bytes, vmem_limit = _block_budget(itemsize)
    budget_elems = max(sublane * 128, block_bytes // itemsize)

    # ---- Column tile: prefer the full hidden width (maximal contiguous HBM
    # burst per row). Only for huge d fall back to the largest 128-multiple
    # divisor of d_pad that still leaves room for >= one sublane row group,
    # keeping the up-view block offset (j + n_col_blocks) exact.
    if d_pad * sublane <= budget_elems:
        ct = d_pad
    else:
        ct_cap = max(128, ((budget_elems // sublane) // 128) * 128)
        ct = 128
        c = 256
        while c <= min(d_pad, ct_cap):
            if d_pad % c == 0:
                ct = c
            c += 128
    n_col_blocks = d_pad // ct

    # ---- Row tile: fill the remaining block budget (grow ct before rt).
    rt = max(sublane, ((budget_elems // ct) // sublane) * sublane)
    if rt >= n_rows:
        rt = n_rows  # full-extent blocks are always layout-legal

    # ---- Guarantee >= 2 blocks on a shardable axis (v7x has 2 TCs/chip).
    if pl.cdiv(n_rows, rt) * n_col_blocks == 1:
        if n_rows > sublane:
            rt = max(sublane, ((rt // 2) // sublane) * sublane)
        elif d_pad >= 256 and (d_pad // 2) % 128 == 0:
            ct = d_pad // 2
            n_col_blocks = 2
        # else: truly tiny shape; nothing worth splitting.

    grid = (pl.cdiv(n_rows, rt), n_col_blocks)

    # Two BlockSpec "views" of the same array: gate reads column block j,
    # up reads column block j + n_col_blocks (exact: ct divides d_pad).
    # TODO(synk): sweep pipeline_mode=pl.Buffered(3) on the input specs once
    # profiled; low-single-digit % at best and costs one extra block per
    # stream of VMEM (matters most on v7x's 64 MiB).
    gate_spec = pl.BlockSpec((rt, ct), lambda i, j: (i, j))
    up_spec = pl.BlockSpec((rt, ct), lambda i, j: (i, j + n_col_blocks))
    out_spec = pl.BlockSpec((rt, ct), lambda i, j: (i, j))

    # Advisory: pure HBM streaming (read 2d, write d), one exp per output elem.
    ce = pl.CostEstimate(
        flops=4 * n_rows * d,
        transcendentals=n_rows * d,
        bytes_accessed=3 * n_rows * d * itemsize,
    )

    kernel = functools.partial(_silu_and_mul_kernel, approx_sigmoid=(itemsize < 4))

    out2 = pl.pallas_call(
        kernel,
        out_shape=jax.ShapeDtypeStruct((n_rows, d_pad), x.dtype),
        grid_spec=pltpu.PrefetchScalarGridSpec(
            num_scalar_prefetch=0,
            grid=grid,
            in_specs=[gate_spec, up_spec],
            out_specs=out_spec,
        ),
        compiler_params=pltpu.CompilerParams(
            # TODO(synk): if an xprof on v7x shows one TC idle, switch the row
            # axis to pltpu.CORE_PARALLEL.
            dimension_semantics=("parallel", "parallel"),
            vmem_limit_bytes=vmem_limit,
        ),
        cost_estimate=ce,
    )(x2, x2)

    if d_pad != d:
        out2 = out2[:, :d]
    return out2.reshape(*lead_shape, d)


def _reference(x: jax.Array) -> jax.Array:
    d = x.shape[-1] // 2
    a = x[..., :d].astype(jnp.float32)
    b = x[..., d:].astype(jnp.float32)
    return (a * jax.nn.sigmoid(a) * b).astype(x.dtype)


if __name__ == "__main__":
    key = jax.random.PRNGKey(0)
    k1, k2, k3 = jax.random.split(key, 3)

    # Case 1: toy shape from the module spec (d=32 -> wrapper pads to 128).
    batch, seq, hidden = 2, 8, 32
    x = jax.random.normal(k1, (batch, seq, 2 * hidden), dtype=jnp.float32)
    out = silu_and_mul(x)
    jax.block_until_ready(out)
    ref = _reference(x)
    assert out.shape == (batch, seq, hidden), out.shape
    assert jnp.allclose(out, ref, atol=1e-5, rtol=1e-5), "padded path mismatch (f32)"

    # Case 2: lane-aligned hidden dim (d=256), f32 (exact sigmoid path).
    hidden2 = 256
    xa = jax.random.normal(k2, (batch, seq, 2 * hidden2), dtype=jnp.float32)
    outa = silu_and_mul(xa)
    jax.block_until_ready(outa)
    refa = _reference(xa)
    assert outa.shape == (batch, seq, hidden2), outa.shape
    assert jnp.allclose(outa, refa, atol=1e-5, rtol=1e-5), "tiled path mismatch (f32)"

    # Case 3: bf16 input (f32 compute, exp + approx-reciprocal sigmoid).
    xb = jax.random.normal(k3, (batch, seq, 2 * hidden2), dtype=jnp.bfloat16)
    outb = silu_and_mul(xb)
    jax.block_until_ready(outb)
    refb = _reference(xb)
    assert outb.shape == (batch, seq, hidden2), outb.shape
    assert jnp.allclose(outb.astype(jnp.float32), refb.astype(jnp.float32),
                        atol=5e-2, rtol=5e-2), "tiled path mismatch (bf16)"

    print("KERNEL_OK")
</pallas_src>

<mosaic_0001>
module attributes {stable_mosaic.version = 11 : i64} {
  func.func @_silu_and_mul_kernel(%arg0: i32, %arg1: i32, %arg2: memref<8x128xf32, #tpu.memory_space<vmem>>, %arg3: memref<8x128xf32, #tpu.memory_space<vmem>>, %arg4: memref<8x128xf32, #tpu.memory_space<vmem>>) attributes {dimension_semantics = [#tpu.dimension_semantics<parallel>, #tpu.dimension_semantics<parallel>], iteration_bounds = array<i64: 2, 1>, scalar_prefetch = 0 : i64, scratch_operands = 0 : i64, tpu.core_type = #tpu.core_type<tc>, window_params = [{transform_indices = @transform_0, window_bounds = array<i64: 8, 128>}, {transform_indices = @transform_1, window_bounds = array<i64: 8, 128>}, {transform_indices = @transform_2, window_bounds = array<i64: 8, 128>}]} {
    %c0 = arith.constant 0 : index
    %c0_0 = arith.constant 0 : index
    %0 = vector.load %arg2[%c0, %c0_0] : memref<8x128xf32, #tpu.memory_space<vmem>>, vector<8x128xf32>
    %c0_1 = arith.constant 0 : index
    %c0_2 = arith.constant 0 : index
    %1 = vector.load %arg3[%c0_1, %c0_2] : memref<8x128xf32, #tpu.memory_space<vmem>>, vector<8x128xf32>
    %2 = arith.negf %0 : vector<8x128xf32>
    %3 = math.exp %2 : vector<8x128xf32>
    %cst = arith.constant 1.000000e+00 : f32
    %4 = vector.broadcast %cst : f32 to vector<8x128xf32>
    %5 = arith.addf %4, %3 : vector<8x128xf32>
    %6 = arith.divf %4, %5 : vector<8x128xf32>
    %7 = arith.mulf %0, %6 : vector<8x128xf32>
    %8 = arith.mulf %7, %1 : vector<8x128xf32>
    %c0_3 = arith.constant 0 : index
    %c0_4 = arith.constant 0 : index
    %9 = vector.load %arg4[%c0_3, %c0_4] : memref<8x128xf32, #tpu.memory_space<vmem>>, vector<8x128xf32>
    tpu.vector_store %arg4[%c0_3, %c0_4], %8 {strides = array<i32>} : memref<8x128xf32, #tpu.memory_space<vmem>>, vector<8x128xf32>,
    return
  }
  func.func @transform_0(%arg0: i32, %arg1: i32) -> (i32, i32) {
    %c0_i32 = arith.constant 0 : i32
    return %arg0, %arg1 : i32, i32
  }
  func.func @transform_1(%arg0: i32, %arg1: i32) -> (i32, i32) {
    %c1_i32 = arith.constant 1 : i32
    %0 = arith.addi %arg1, %c1_i32 : i32
    %c0_i32 = arith.constant 0 : i32
    return %arg0, %0 : i32, i32
  }
  func.func @transform_2(%arg0: i32, %arg1: i32) -> (i32, i32) {
    %c0_i32 = arith.constant 0 : i32
    return %arg0, %arg1 : i32, i32
  }
}

</mosaic_0001>

<bundles_post_ra>
// kernel: tpu_custom_call.1
= control target key start
LH: loop header
LB: loop body
LE: loop exit
PB: predicated region body
PF: predicated region fallthrough
CT: control target
= control target key end

     0   :  { %7 = vsyncpa [#allocation3], 0  ;;  %s770_s0 = inlined_call_operand.hbm [shape: f32[16,256], index: 0, kind: input, shape index: {}]   ;;  %s771_s1 = inlined_call_operand.hbm [shape: f32[16,256], index: 1, kind: input, shape index: {}]   ;;  %s772_s2 = inlined_call_operand.hbm [shape: f32[16,128], index: 2, kind: output, shape index: {}]  }
   0x1   :  { %9 = vsyncpa [#allocation3 + $0x1], 0 }
   0x2   :  { %10 = vsyncpa [#allocation6], 0 }
   0x3   :  { %12 = vsyncpa [#allocation6 + $0x1], 0 }
   0x4   :  { %13 = vsyncpa [#allocation4], 0 }
   0x5   :  { %15 = vsyncpa [#allocation4 + $0x1], 0  ;;  %s629_s9 = smov 0   ;;  %s631_s10 = smov 0  }
   0x6   :  { %s633_s11 = smov 0   ;;  %s635_s12 = smov 0  }
   0x7   :  { %s637_s13 = smov 0   ;;  %s639_s14 = smov 0  }
   0x8 LB: > { %s374_s15 = sadd.s32 4294967295, %s612_s14   ;;  %s375_s16 = sadd.s32 4294967294, %s612_s14   ;;  %s612_s14 = sphi %s639_s14, %s21_s14   ;;  %s608_s13 = sphi %s637_s13, %s782_s13   ;;  %s604_s12 = sphi %s635_s12, %s781_s12   ;;  %s600_s11 = sphi %s633_s11, %s780_s11   ;;  %s596_s10 = sphi %s631_s10, %s779_s10   ;;  %s592_s9 = sphi %s629_s9, %s778_s9  }
   0x9   : > { %s33_s17 = sadd.s32 1, %s608_s13  ;;  %s42_s18 = sadd.s32 1, %s600_s11 }
   0xa   : > { %p35_p0 = scmp.ge.s32.totalorder %s33_s17, 2  ;;  %p49_p1 = scmp.ne.s32.totalorder %s600_s11, %s596_s10 }
   0xb   : > { %p50_p2 = scmp.eq.s32.totalorder %s612_s14, 0  ;;  %p55_p3 = scmp.ne.s32.totalorder %s596_s10, %s592_s9 }
   0xc   : > { %s784_s17 = smov (%p35_p0, %s33_s17), 0  ;;  %p56_p5 = scmp.eq.s32.totalorder %s374_s15, 0 }
   0xd   : > { %p670_p4 = por %p50_p2, %p49_p1  ;;  %s37_s20 = ssub.s32 %s608_s13, %s784_s17 }
   0xe   : > { %p111_p6 = scmp.eq.s32.totalorder %s374_s15, 1  ;;  %p40_p7 = scmp.eq.s32.totalorder %s37_s20, 0 }
   0xf   : > { %p676_p8 = por %p56_p5, %p55_p3  ;;  %p117_p10 = scmp.eq.s32.totalorder %s375_s16, 1 }
  0x10   : > { %p680_p9 = por %p111_p6, %p49_p1  ;;  %p377_p12 = scmp.ge.s32.totalorder %s612_s14, 2 }
  0x11   : > { %s685_s23 = scalar_select %p40_p7, %s600_s11, %s42_s18  }
  0x12   : > { %p687_p11 = por %p117_p10, %p55_p3  ;;  %p412_p13 = scmp.lt.s32.totalorder %s612_s14, 2 }
  0x13   : > { %s137_s25 = sand.u32 1, %s600_s11   ;;  %s393_s27 = sshll.u32 %s608_s13, 4 }
  0x14   : > { %s378_s26 = sshll.u32 %s137_s25, 3  ;;  %s147_s30 = scalar_lea.hbm %s770_s0, %s393_s27 }
  0x15   : > { %s141_s3 = scalar_lea.vmem [#allocation2], %s378_s26  ;;  %s149_s5 = sshll.u32 %s147_s30, 4  ;;  %s150_s5 = int_to_ptr.hbm [resolvable:$true] %s149_s5 }
  0x16   : > { %s151_s4 = sshll.u32 %s141_s3, 4  ;;  %p700_p0 = pnand %p412_p13, %p670_p4  ;;  %s152_s4 = int_to_ptr.vmem [resolvable:$true] %s151_s4 }
  0x17   : > { %p384_p1 = scmp.ge.s32.totalorder %s612_s14, 1  ;;  %p178_p2 = scmp.lt.s32.totalorder %s612_s14, 3 }
  0x18   : > { %s138_s7 = scalar_lea.sflag [#allocation3], %s137_s25  ;;  %s307_s16 = scalar_lea.hbm %s771_s1, %s393_s27 }
  0x19   : > { %404 = dma.hbm_to_vmem [thread:$0]  (!%p700_p0), %s150_s5, 128, %s152_s4, %s138_s7  }
  0x1a   : > { %p179_p3 = pnand %p384_p1, %p178_p2  ;;  %s162_s18 = scalar_lea.vmem [#allocation5], %s378_s26 }
  0x1b   : > { %s173_s20 = sshll.u32 %s162_s18, 4  ;;  %s308_s28 = scalar_lea.hbm %s307_s16, 8  ;;  %s174_s20 = int_to_ptr.vmem [resolvable:$true] %s173_s20 }
  0x1c   : > { %s171_s19 = sshll.u32 %s308_s28, 4  ;;  %s159_s29 = scalar_lea.sflag [#allocation6], %s137_s25  ;;  %s172_s19 = int_to_ptr.hbm [resolvable:$true] %s171_s19 }
  0x1d   : > { %407 = dma.hbm_to_vmem [thread:$0]  (!%p700_p0), %s172_s19, 128, %s174_s20, %s159_s29  }
  0x1e   : > { %182 = sbr.rel (%p179_p3) target bundleno = 74 (0x4a), region = 28  ;;  %s714_s30 = sand.u32 (!%p179_p3), 1, %s596_s10  }
  0x1f   : > { %s717_s3 = sshll.u32 (!%p179_p3), %s714_s30, 3  ;;  %s185_s27 = scalar_lea.sflag (!%p179_p3), [#allocation3], %s714_s30 }
  0x20   : > { %s188_s26 = scalar_lea.vmem (!%p179_p3), [#allocation2], %s717_s3 }
  0x23   : > { %579 = dma.done.wait (%p676_p8), %s185_s27, 128  }
  0x24   : > { %581 = vsyncadd (%p676_p8), %s185_s27, 4294967168  ;;  %s195_s25 = scalar_lea.sflag [#allocation6], %s714_s30  ;;  %s198_s4 = scalar_lea.vmem [#allocation5], %s717_s3 }
  0x25   : > { %583 = dma.done.wait (%p676_p8), %s195_s25, 128  }
  0x26   : > { %585 = vsyncadd (%p676_p8), %s195_s25, 4294967168  ;;  %v226_v0 = vld [vmem:[%s188_s26] sm:$0xff]  ;;  %s390_s5 = sshll.u32 %s604_s12, 3  ;;  %v227_v13 = vld [vmem:[%s198_s4] sm:$0xff]  ;;  %s224_s8 = scalar_lea.vmem [#allocation7], %s717_s3 }
  0x27   : > { %v388_v1 = vmul.f32 -1.442695, %v226_v0  ;;  %s262_s7 = scalar_lea.hbm %s772_s2, %s390_s5  ;;  %s264_s15 = sshll.u32 %s224_s8, 4  ;;  %s265_s15 = int_to_ptr.vmem [resolvable:$true] %s264_s15 }
  0x28   : > { %s266_s16 = sshll.u32 %s262_s7, 4  ;;  %s251_s12 = scalar_lea.sflag [#allocation4], %s714_s30  ;;  %s267_s16 = int_to_ptr.hbm [resolvable:$true] %s266_s16 }
  0x29   : > { %462 = vpow2.f32 %v388_v1  ;;  %s540_s18 = sshra.s32 %s267_s16, 4  ;;  %s546_s29 = scalar_lea.hbm %s772_s2, 16  ;;  %s541_s18 = int_to_ptr.hbm [resolvable:$true] %s540_s18 }
  0x2a   : > { %s542_s20 = scalar_lea.hbm %s541_s18, 8  ;;  %p547_p7 = scmp.lt.s32.totalorder %s541_s18, %s772_s2 }
  0x2b   : > { %p543_p4 = scmp.ne.s32.totalorder %s541_s18, %s542_s20  ;;  %p548_p8 = scmp.lt.s32.totalorder %s546_s29, %s542_s20 }
  0x2d   : > { %p544_p5 = pnand %p543_p4, %p680_p9  ;;  %p549_p10 = por %p548_p8, %p547_p7 }
  0x2f   : > { %v463_v2 = vpop.eup %462  ;;  %p545_p6 = pneg %p544_p5 }
  0x30   : > { %v231_v3 = vadd.f32 1.0, %v463_v2 }
  0x31   : > { %p550_p13 = pnand %p549_p10, %p545_p6 }
  0x32   : > { %464 = vrcp.f32 %v231_v3  ;;  %v243_v6 = vand.u32 2147483648, %v231_v3  ;;  %vm237_vm0 = vweird.f32 %v231_v3  ;;  %v241_v8 = vand.u32 2147483647, %v231_v3 }
  0x34   : > { %v244_v10 = vor.u32 1.1754944e-38, %v243_v6  ;;  %vm242_vm3 = vcmp.eq.f32.partialorder %v241_v8, 8.507059e+37 }
  0x38   : > { %v465_v4 = vpop.eup %464 }
  0x39   : > { %v233_v5 = vmul.f32 %v465_v4, %v231_v3  ;;  %vm238_vm1 = vweird.f32 %v465_v4 }
  0x3a   : > { %vm239_vm2 = vmor %vm237_vm0, %vm238_vm1 }
  0x3b   : > { %v234_v7 = vsub.f32 1.0, %v233_v5 }
  0x3d   : > { %v235_v9 = vmul.f32 %v465_v4, %v234_v7 }
  0x3f   : > { %v236_v11 = vadd.f32 %v465_v4, %v235_v9 }
  0x41   : > { %v240_v12 = vsel %vm239_vm2, %v465_v4, %v236_v11 }
  0x42   : > { %v245_v14 = vsel %vm242_vm3, %v244_v10, %v240_v12 }
  0x43   : > { %v247_v15 = vmul.f32 %v245_v14, %v226_v0 }
  0x45   : > { %v248_v16 = vmul.f32 %v247_v15, %v227_v13 }
  0x47   : > { %249 = vst [vmem:[%s224_s8] sm:$0xff] %v248_v16 }
  0x48   : > { %553 = shalt.err (!%p550_p13)
}
  0x49   : > { %399 = dma.vmem_to_hbm [thread:$0]  (%p680_p9), %s265_s15, 128, %s267_s16, %s251_s12  }
  0x4a PF: > { %s278_s30 = sand.u32 1, %s592_s9   ;;  %p409_p0 = pnand %p377_p12, %p687_p11 }
  0x4b   : > { %s279_s26 = scalar_lea.sflag [#allocation4], %s278_s30 }
  0x4c   : > { %p410_p1 = pneg %p409_p0 }
  0x4e   : > { %587 = dma.done.wait (%p410_p1), %s279_s26, 128  }
  0x4f   : > { %589 = vsyncadd (%p410_p1), %s279_s26, 4294967168  ;;  %s21_s14 = sadd.s32 1, %s612_s14   ;;  %s778_s9 = smov %s596_s10 }
  0x50   : > { %p18_p2 = scmp.ge.s32.totalorder %s21_s14, 4   ;;  %s779_s10 = smov %s600_s11 }
  0x51   : > { %s780_s11 = smov %s685_s23  ;;  %s781_s12 = smov %s608_s13 }
  0x52   : > { %s782_s13 = smov %s784_s17  ;;  %20 = sbr.rel (!%p18_p2) target bundleno = 8 (0x8), region = 86 }
  0x57   :  { %285 = vsyncpa [#allocation3], 1 }
  0x58   :  { %287 = vsyncpa [#allocation3 + $0x1], 1 }
  0x59   :  { %288 = vsyncpa [#allocation6], 1 }
  0x5a   :  { %290 = vsyncpa [#allocation6 + $0x1], 1 }
  0x5b   :  { %291 = vsyncpa [#allocation4], 1 }
  0x5c   :  { %293 = vsyncpa [#allocation4 + $0x1], 1 }

</bundles_post_ra>
